<compile_context>
chip_gen: v5e
topology: v5e:2x2
jax: 0.10.0
libtpu: 0.0.40
codegen_flags: <defaults>
</compile_context>

<pallas_src>
import jax
import jax.numpy as jnp
from jax.experimental import pallas as pl
from jax.experimental.pallas import tpu as pltpu

LN_EPS = 1e-5


def _round_up(n, m):
    return ((n + m - 1) // m) * m


def swiglu_net_kernel(x_ref, gamma_ref, beta_ref,
                      w1v_ref, b1v_ref, w1g_ref, b1g_ref,
                      w2_ref, b2_ref, o_ref):
    # ---- LayerNorm over the feature dim (statistics in f32) ----
    x = x_ref[...].astype(jnp.float32)
    mean = jnp.mean(x, axis=-1, keepdims=True)
    var = jnp.mean((x - mean) * (x - mean), axis=-1, keepdims=True)
    xn = (x - mean) * jax.lax.rsqrt(var + LN_EPS)
    xn = xn * gamma_ref[...].astype(jnp.float32) + beta_ref[...].astype(jnp.float32)
    # Feed the MXU in the weights' native dtype (bf16 stays bf16, f32 stays f32).
    xn = xn.astype(w1v_ref.dtype)

    # ---- Dropout(p=0.0): identity in eval ----
    # TODO(synk): training-mode dropout (p>0) is not implemented in this kernel.

    # ---- Linear(d_in, 2*d_out), split into val / gate halves (lane-aligned) ----
    val = jnp.dot(xn, w1v_ref[...], preferred_element_type=jnp.float32)
    val = val + b1v_ref[...].astype(jnp.float32)
    gate = jnp.dot(xn, w1g_ref[...], preferred_element_type=jnp.float32)
    gate = gate + b1g_ref[...].astype(jnp.float32)

    # ---- SwiGLU: silu(gate) * val  (gate = second chunk, val = first chunk) ----
    s = (gate * jax.nn.sigmoid(gate)) * val

    # ---- Linear(d_out, d_out) ----
    out = jnp.dot(s.astype(w2_ref.dtype), w2_ref[...],
                  preferred_element_type=jnp.float32)
    out = out + b2_ref[...].astype(jnp.float32)

    o_ref[...] = out.astype(o_ref.dtype)


def swiglu_net(x, gamma, beta, w1, b1, w2, b2, *,
               block_b=256, vmem_limit_bytes=48 * 1024 * 1024):
    """x: [B, d_in] -> [B, d_out]."""
    B, d_in = x.shape
    two_d_out = w1.shape[1]
    d_out = two_d_out // 2
    assert w2.shape == (d_out, d_out)

    # Pre-split W1/b1 into the SwiGLU val/gate halves (lane-aligned slices).
    w1_val, w1_gate = w1[:, :d_out], w1[:, d_out:]
    b1_val = b1[:d_out].reshape(1, d_out)
    b1_gate = b1[d_out:].reshape(1, d_out)
    gamma2 = gamma.reshape(1, d_in)
    beta2 = beta.reshape(1, d_in)
    b2_2 = b2.reshape(1, d_out)

    # Batch tile: big enough to fill the MXU, clipped to the (8-aligned) batch.
    block_b = max(8, min(block_b, _round_up(B, 8)))
    Bp = _round_up(B, block_b)
    xp = jnp.pad(x, ((0, Bp - B), (0, 0))) if Bp != B else x

    grid = (Bp // block_b,)

    # Constant-index operands: single-buffered (halves weight VMEM footprint).
    def const_spec(shape):
        return pl.BlockSpec(shape, lambda i: (0, 0), pipeline_mode=pl.Buffered(1))

    itemsize = jnp.dtype(x.dtype).itemsize
    flops = 2 * Bp * d_in * two_d_out + 2 * Bp * d_out * d_out
    bytes_accessed = (Bp * d_in + d_in * two_d_out + d_out * d_out
                      + Bp * d_out) * itemsize
    cost = pl.CostEstimate(flops=int(flops),
                           transcendentals=int(Bp * (d_out + 1)),
                           bytes_accessed=int(bytes_accessed))

    out = pl.pallas_call(
        swiglu_net_kernel,
        out_shape=jax.ShapeDtypeStruct((Bp, d_out), x.dtype),
        grid_spec=pltpu.PrefetchScalarGridSpec(
            num_scalar_prefetch=0,
            grid=grid,
            in_specs=[
                pl.BlockSpec((block_b, d_in), lambda i: (i, 0)),  # x tile
                const_spec((1, d_in)),        # LN gamma
                const_spec((1, d_in)),        # LN beta
                const_spec((d_in, d_out)),    # W1 val half
                const_spec((1, d_out)),       # b1 val half
                const_spec((d_in, d_out)),    # W1 gate half
                const_spec((1, d_out)),       # b1 gate half
                const_spec((d_out, d_out)),   # W2
                const_spec((1, d_out)),       # b2
            ],
            out_specs=pl.BlockSpec((block_b, d_out), lambda i: (i, 0)),
        ),
        compiler_params=pltpu.CompilerParams(
            dimension_semantics=("parallel",),
            vmem_limit_bytes=vmem_limit_bytes,
        ),
        cost_estimate=cost,
    )(xp, gamma2, beta2, w1_val, b1_val, w1_gate, b1_gate, w2, b2_2)

    return out[:B] if Bp != B else out


def swiglu_net_ref(x, gamma, beta, w1, b1, w2, b2):
    """Pure-JAX reference matching the PyTorch module forward."""
    xf = x.astype(jnp.float32)
    mean = jnp.mean(xf, axis=-1, keepdims=True)
    var = jnp.mean((xf - mean) ** 2, axis=-1, keepdims=True)
    xn = (xf - mean) / jnp.sqrt(var + LN_EPS)
    xn = xn * gamma + beta
    h = xn @ w1 + b1
    d_out = w2.shape[0]
    val, gate = h[:, :d_out], h[:, d_out:]
    s = gate * jax.nn.sigmoid(gate) * val
    return (s @ w2 + b2).astype(x.dtype)


if __name__ == "__main__":
    key = jax.random.PRNGKey(0)
    # Small, lane-friendly feature dims; batch NOT a multiple of the tile so the
    # pad-and-slice path is exercised.
    B, d_in, d_out = 50, 128, 128

    kx, kw1, kb1, kw2, kb2 = jax.random.split(key, 5)

    x = jax.random.normal(kx, (B, d_in), dtype=jnp.float32)

    # Deterministic synthetic parameters (uniform, like nn.Linear's init scheme).
    lim1 = 1.0 / jnp.sqrt(d_in)
    lim2 = 1.0 / jnp.sqrt(d_out)
    w1 = jax.random.uniform(kw1, (d_in, 2 * d_out), jnp.float32, -lim1, lim1)
    b1 = jax.random.uniform(kb1, (2 * d_out,), jnp.float32, -lim1, lim1)
    w2 = jax.random.uniform(kw2, (d_out, d_out), jnp.float32, -lim2, lim2)
    b2 = jax.random.uniform(kb2, (d_out,), jnp.float32, -lim2, lim2)
    gamma = jnp.ones((d_in,), jnp.float32)   # LayerNorm default affine init
    beta = jnp.zeros((d_in,), jnp.float32)

    # block_b=16 keeps the demo grid length > 1 (multi-step pipeline + padding);
    # real workloads use the default block_b=256.
    out = swiglu_net(x, gamma, beta, w1, b1, w2, b2, block_b=16)
    out = jax.block_until_ready(out)

    ref = swiglu_net_ref(x, gamma, beta, w1, b1, w2, b2)
    assert out.shape == (B, d_out)
    assert jnp.allclose(out, ref, atol=1e-4, rtol=1e-4), "mismatch vs reference"

    print("KERNEL_OK")
</pallas_src>

<mosaic_0001>
module attributes {stable_mosaic.version = 11 : i64} {
  func.func @swiglu_net_kernel(%arg0: i32, %arg1: memref<16x128xf32, #tpu.memory_space<vmem>>, %arg2: memref<1x128xf32, #tpu.memory_space<vmem>>, %arg3: memref<1x128xf32, #tpu.memory_space<vmem>>, %arg4: memref<128x128xf32, #tpu.memory_space<vmem>>, %arg5: memref<1x128xf32, #tpu.memory_space<vmem>>, %arg6: memref<128x128xf32, #tpu.memory_space<vmem>>, %arg7: memref<1x128xf32, #tpu.memory_space<vmem>>, %arg8: memref<128x128xf32, #tpu.memory_space<vmem>>, %arg9: memref<1x128xf32, #tpu.memory_space<vmem>>, %arg10: memref<16x128xf32, #tpu.memory_space<vmem>>) attributes {dimension_semantics = [#tpu.dimension_semantics<parallel>], iteration_bounds = array<i64: 4>, scalar_prefetch = 0 : i64, scratch_operands = 0 : i64, tpu.core_type = #tpu.core_type<tc>, window_params = [{transform_indices = @transform_0, window_bounds = array<i64: 16, 128>}, {pipeline_mode = #tpu.pipeline_mode<synchronous>, transform_indices = @transform_1, window_bounds = array<i64: 1, 128>}, {pipeline_mode = #tpu.pipeline_mode<synchronous>, transform_indices = @transform_2, window_bounds = array<i64: 1, 128>}, {pipeline_mode = #tpu.pipeline_mode<synchronous>, transform_indices = @transform_3, window_bounds = array<i64: 128, 128>}, {pipeline_mode = #tpu.pipeline_mode<synchronous>, transform_indices = @transform_4, window_bounds = array<i64: 1, 128>}, {pipeline_mode = #tpu.pipeline_mode<synchronous>, transform_indices = @transform_5, window_bounds = array<i64: 128, 128>}, {pipeline_mode = #tpu.pipeline_mode<synchronous>, transform_indices = @transform_6, window_bounds = array<i64: 1, 128>}, {pipeline_mode = #tpu.pipeline_mode<synchronous>, transform_indices = @transform_7, window_bounds = array<i64: 128, 128>}, {pipeline_mode = #tpu.pipeline_mode<synchronous>, transform_indices = @transform_8, window_bounds = array<i64: 1, 128>}, {transform_indices = @transform_9, window_bounds = array<i64: 16, 128>}]} {
    %c0 = arith.constant 0 : index
    %c0_0 = arith.constant 0 : index
    %0 = vector.load %arg1[%c0, %c0_0] : memref<16x128xf32, #tpu.memory_space<vmem>>, vector<16x128xf32>
    %cst = arith.constant dense<0.000000e+00> : vector<16xf32>
    %1 = vector.multi_reduction <add>, %0, %cst [1] : vector<16x128xf32> to vector<16xf32>
    %2 = vector.shape_cast %1 : vector<16xf32> to vector<16x1xf32>
    %cst_1 = arith.constant 1.280000e+02 : f32
    %3 = vector.broadcast %cst_1 : f32 to vector<16x1xf32>
    %4 = arith.divf %2, %3 : vector<16x1xf32>
    %5 = vector.broadcast %4 : vector<16x1xf32> to vector<16x128xf32>
    %6 = arith.subf %0, %5 : vector<16x128xf32>
    %7 = vector.broadcast %4 : vector<16x1xf32> to vector<16x128xf32>
    %8 = arith.subf %0, %7 : vector<16x128xf32>
    %9 = arith.mulf %6, %8 : vector<16x128xf32>
    %cst_2 = arith.constant dense<0.000000e+00> : vector<16xf32>
    %10 = vector.multi_reduction <add>, %9, %cst_2 [1] : vector<16x128xf32> to vector<16xf32>
    %11 = vector.shape_cast %10 : vector<16xf32> to vector<16x1xf32>
    %cst_3 = arith.constant 1.280000e+02 : f32
    %12 = vector.broadcast %cst_3 : f32 to vector<16x1xf32>
    %13 = arith.divf %11, %12 : vector<16x1xf32>
    %14 = vector.broadcast %4 : vector<16x1xf32> to vector<16x128xf32>
    %15 = arith.subf %0, %14 : vector<16x128xf32>
    %cst_4 = arith.constant 9.99999974E-6 : f32
    %16 = vector.broadcast %cst_4 : f32 to vector<16x1xf32>
    %17 = arith.addf %13, %16 : vector<16x1xf32>
    %18 = math.rsqrt %17 : vector<16x1xf32>
    %19 = vector.broadcast %18 : vector<16x1xf32> to vector<16x128xf32>
    %20 = arith.mulf %15, %19 : vector<16x128xf32>
    %c0_5 = arith.constant 0 : index
    %c0_6 = arith.constant 0 : index
    %21 = vector.load %arg2[%c0_5, %c0_6] : memref<1x128xf32, #tpu.memory_space<vmem>>, vector<1x128xf32>
    %22 = vector.broadcast %21 : vector<1x128xf32> to vector<16x128xf32>
    %23 = arith.mulf %20, %22 : vector<16x128xf32>
    %c0_7 = arith.constant 0 : index
    %c0_8 = arith.constant 0 : index
    %24 = vector.load %arg3[%c0_7, %c0_8] : memref<1x128xf32, #tpu.memory_space<vmem>>, vector<1x128xf32>
    %25 = vector.broadcast %24 : vector<1x128xf32> to vector<16x128xf32>
    %26 = arith.addf %23, %25 : vector<16x128xf32>
    %c0_9 = arith.constant 0 : index
    %c0_10 = arith.constant 0 : index
    %27 = vector.load %arg4[%c0_9, %c0_10] : memref<128x128xf32, #tpu.memory_space<vmem>>, vector<128x128xf32>
    %cst_11 = arith.constant dense<0.000000e+00> : vector<16x128xf32>
    %28 = tpu.matmul %26, %27, %cst_11 {dimension_numbers = #tpu.dot_dimension_numbers<[1], [0], [0], [1], [0, 0, 1, 1], [], []>} : vector<16x128xf32>, vector<128x128xf32>, vector<16x128xf32> -> vector<16x128xf32>
    %c0_12 = arith.constant 0 : index
    %c0_13 = arith.constant 0 : index
    %29 = vector.load %arg5[%c0_12, %c0_13] : memref<1x128xf32, #tpu.memory_space<vmem>>, vector<1x128xf32>
    %30 = vector.broadcast %29 : vector<1x128xf32> to vector<16x128xf32>
    %31 = arith.addf %28, %30 : vector<16x128xf32>
    %c0_14 = arith.constant 0 : index
    %c0_15 = arith.constant 0 : index
    %32 = vector.load %arg6[%c0_14, %c0_15] : memref<128x128xf32, #tpu.memory_space<vmem>>, vector<128x128xf32>
    %cst_16 = arith.constant dense<0.000000e+00> : vector<16x128xf32>
    %33 = tpu.matmul %26, %32, %cst_16 {dimension_numbers = #tpu.dot_dimension_numbers<[1], [0], [0], [1], [0, 0, 1, 1], [], []>} : vector<16x128xf32>, vector<128x128xf32>, vector<16x128xf32> -> vector<16x128xf32>
    %c0_17 = arith.constant 0 : index
    %c0_18 = arith.constant 0 : index
    %34 = vector.load %arg7[%c0_17, %c0_18] : memref<1x128xf32, #tpu.memory_space<vmem>>, vector<1x128xf32>
    %35 = vector.broadcast %34 : vector<1x128xf32> to vector<16x128xf32>
    %36 = arith.addf %33, %35 : vector<16x128xf32>
    %37 = arith.negf %36 : vector<16x128xf32>
    %38 = math.exp %37 : vector<16x128xf32>
    %cst_19 = arith.constant 1.000000e+00 : f32
    %39 = vector.broadcast %cst_19 : f32 to vector<16x128xf32>
    %40 = arith.addf %39, %38 : vector<16x128xf32>
    %41 = arith.divf %39, %40 : vector<16x128xf32>
    %42 = arith.mulf %36, %41 : vector<16x128xf32>
    %43 = arith.mulf %42, %31 : vector<16x128xf32>
    %c0_20 = arith.constant 0 : index
    %c0_21 = arith.constant 0 : index
    %44 = vector.load %arg8[%c0_20, %c0_21] : memref<128x128xf32, #tpu.memory_space<vmem>>, vector<128x128xf32>
    %cst_22 = arith.constant dense<0.000000e+00> : vector<16x128xf32>
    %45 = tpu.matmul %43, %44, %cst_22 {dimension_numbers = #tpu.dot_dimension_numbers<[1], [0], [0], [1], [0, 0, 1, 1], [], []>} : vector<16x128xf32>, vector<128x128xf32>, vector<16x128xf32> -> vector<16x128xf32>
    %c0_23 = arith.constant 0 : index
    %c0_24 = arith.constant 0 : index
    %46 = vector.load %arg9[%c0_23, %c0_24] : memref<1x128xf32, #tpu.memory_space<vmem>>, vector<1x128xf32>
    %47 = vector.broadcast %46 : vector<1x128xf32> to vector<16x128xf32>
    %48 = arith.addf %45, %47 : vector<16x128xf32>
    %c0_25 = arith.constant 0 : index
    %c0_26 = arith.constant 0 : index
    %49 = vector.load %arg10[%c0_25, %c0_26] : memref<16x128xf32, #tpu.memory_space<vmem>>, vector<16x128xf32>
    tpu.vector_store %arg10[%c0_25, %c0_26], %48 {strides = array<i32>} : memref<16x128xf32, #tpu.memory_space<vmem>>, vector<16x128xf32>,
    return
  }
  func.func @transform_0(%arg0: i32) -> (i32, i32) {
    %c0_i32 = arith.constant 0 : i32
    %c0_i32_0 = arith.constant 0 : i32
    return %arg0, %c0_i32 : i32, i32
  }
  func.func @transform_1(%arg0: i32) -> (i32, i32) {
    %c0_i32 = arith.constant 0 : i32
    %c0_i32_0 = arith.constant 0 : i32
    %c0_i32_1 = arith.constant 0 : i32
    return %c0_i32, %c0_i32_0 : i32, i32
  }
  func.func @transform_2(%arg0: i32) -> (i32, i32) {
    %c0_i32 = arith.constant 0 : i32
    %c0_i32_0 = arith.constant 0 : i32
    %c0_i32_1 = arith.constant 0 : i32
    return %c0_i32, %c0_i32_0 : i32, i32
  }
  func.func @transform_3(%arg0: i32) -> (i32, i32) {
    %c0_i32 = arith.constant 0 : i32
    %c0_i32_0 = arith.constant 0 : i32
    %c0_i32_1 = arith.constant 0 : i32
    return %c0_i32, %c0_i32_0 : i32, i32
  }
  func.func @transform_4(%arg0: i32) -> (i32, i32) {
    %c0_i32 = arith.constant 0 : i32
    %c0_i32_0 = arith.constant 0 : i32
    %c0_i32_1 = arith.constant 0 : i32
    return %c0_i32, %c0_i32_0 : i32, i32
  }
  func.func @transform_5(%arg0: i32) -> (i32, i32) {
    %c0_i32 = arith.constant 0 : i32
    %c0_i32_0 = arith.constant 0 : i32
    %c0_i32_1 = arith.constant 0 : i32
    return %c0_i32, %c0_i32_0 : i32, i32
  }
  func.func @transform_6(%arg0: i32) -> (i32, i32) {
    %c0_i32 = arith.constant 0 : i32
    %c0_i32_0 = arith.constant 0 : i32
    %c0_i32_1 = arith.constant 0 : i32
    return %c0_i32, %c0_i32_0 : i32, i32
  }
  func.func @transform_7(%arg0: i32) -> (i32, i32) {
    %c0_i32 = arith.constant 0 : i32
    %c0_i32_0 = arith.constant 0 : i32
    %c0_i32_1 = arith.constant 0 : i32
    return %c0_i32, %c0_i32_0 : i32, i32
  }
  func.func @transform_8(%arg0: i32) -> (i32, i32) {
    %c0_i32 = arith.constant 0 : i32
    %c0_i32_0 = arith.constant 0 : i32
    %c0_i32_1 = arith.constant 0 : i32
    return %c0_i32, %c0_i32_0 : i32, i32
  }
  func.func @transform_9(%arg0: i32) -> (i32, i32) {
    %c0_i32 = arith.constant 0 : i32
    %c0_i32_0 = arith.constant 0 : i32
    return %arg0, %c0_i32 : i32, i32
  }
}

</mosaic_0001>

<bundles_post_ra>
// kernel: tpu_custom_call.1
= control target key start
LH: loop header
LB: loop body
LE: loop exit
PB: predicated region body
PF: predicated region fallthrough
CT: control target
= control target key end

     0   :  { %s1423_s0 = inlined_call_operand.hbm [shape: f32[64,128], index: 0, kind: input, shape index: {}]   ;;  %s1424_s1 = inlined_call_operand.hbm [shape: f32[1,128], index: 1, kind: input, shape index: {}]   ;;  %s1425_s2 = inlined_call_operand.vmem [shape: f32[1,128], index: 2, kind: input, shape index: {}]   ;;  %s1426_s3 = inlined_call_operand.hbm [shape: f32[128,128], index: 3, kind: input, shape index: {}]   ;;  %s1427_s4 = inlined_call_operand.vmem [shape: f32[1,128], index: 4, kind: input, shape index: {}]   ;;  %s1428_s5 = inlined_call_operand.hbm [shape: f32[128,128], index: 5, kind: input, shape index: {}]   ;;  %s1429_s6 = inlined_call_operand.vmem [shape: f32[1,128], index: 6, kind: input, shape index: {}]   ;;  %s1430_s7 = inlined_call_operand.hbm [shape: f32[128,128], index: 7, kind: input, shape index: {}]   ;;  %s1431_s8 = inlined_call_operand.vmem [shape: f32[1,128], index: 8, kind: input, shape index: {}]   ;;  %s1432_s9 = inlined_call_operand.hbm [shape: f32[64,128], index: 9, kind: output, shape index: {}]  }
   0x1   :  { %1435 = sst [smem:[#allocation16_spill]] %s1424_s1 }
   0x2   :  { %1436 = sst [smem:[#allocation17_spill]] %s1426_s3 }
   0x3   :  { %1437 = sst [smem:[#allocation18_spill]] %s1428_s5 }
   0x4   :  { %14 = vsyncpa [#allocation3], 0 }
   0x5   :  { %16 = vsyncpa [#allocation3 + $0x1], 0 }
   0x6   :  { %17 = vsyncpa [#allocation6], 0 }
   0x7   :  { %18 = vsyncpa [#allocation9], 0 }
   0x8   :  { %19 = vsyncpa [#allocation4], 0 }
   0x9   :  { %21 = vsyncpa [#allocation4 + $0x1], 0  ;;  %s1218_s30 = smov 0   ;;  %s1220_s10 = smov 0  }
   0xa   :  { %s1222_s11 = smov 0   ;;  %s1224_s12 = smov 0  }
   0xb LB: > { %s1239_s13 = sadd.s32 4294967295, %s1157_s12   ;;  %s780_s14 = sadd.s32 4294967294, %s1157_s12   ;;  %s1157_s12 = sphi %s1224_s12, %s1452_s12   ;;  %s1153_s11 = sphi %s1222_s11, %s1451_s11   ;;  %s1149_s10 = sphi %s1220_s10, %s1450_s10   ;;  %s1145_s30 = sphi %s1218_s30, %s1449_s30  }
   0xc   : > { %p47_p0 = scmp.ne.s32.totalorder %s1149_s10, %s1145_s30  ;;  %p48_p1 = scmp.eq.s32.totalorder %s1239_s13, 0 }
   0xd   : > { %p239_p2 = scmp.eq.s32.totalorder %s1239_s13, 3  ;;  %p245_p3 = scmp.eq.s32.totalorder %s780_s14, 3 }
   0xe   : > { %p1248_p4 = por %p48_p1, %p47_p0  ;;  %p781_p5 = scmp.ge.s32.totalorder %s1157_s12, 1 }
   0xf   : > { %p1253_p6 = por %p245_p3, %p47_p0  ;;  %p252_p7 = scmp.lt.s32.totalorder %s1157_s12, 5 }
  0x10   : > { %s1440_s1 = sld [smem:[#allocation16_spill]]  ;;  %s1159_s21 = smov [#allocation5]  }
  0x11   : > { %p1261_p8 = pnand %p781_p5, %p252_p7  ;;  %s266_s22 = sshll.u32 %s1159_s21, 4  ;;  %s267_s22 = int_to_ptr.vmem [resolvable:$true] %s266_s22 }
  0x12   : > { %s1443_s5 = sld [smem:[#allocation18_spill]]  ;;  %s1160_s27 = smov [#allocation8]  }
  0x13   : > { %p842_p9 = pneg %p1261_p8  ;;  %s297_s28 = sshll.u32 %s1160_s27, 4  ;;  %s298_s28 = int_to_ptr.vmem [resolvable:$true] %s297_s28 }
  0x14   : > { %s1444_s3 = sld [smem:[#allocation17_spill]]  ;;  %s1433_s18 = smov 128  }
  0x15   : > { %p1269_p10 = pnand %p842_p9, %p48_p1  ;;  %s1434_s21 = smov 8  }
  0x16   : > { %s264_s19 = sshll.u32 %s1440_s1, 4  ;;  %s312_s24 = sshll.u32 %s1430_s7, 4  ;;  %s265_s19 = int_to_ptr.hbm [resolvable:$true] %s264_s19  ;;  %s313_s24 = int_to_ptr.hbm [resolvable:$true] %s312_s24 }
  0x17   : > { %845 = dma.hbm_to_vmem [thread:$0]  (!%p1269_p10), %s265_s19, 16, %s267_s22, [#allocation6]  }
  0x18   : > { %s295_s26 = sshll.u32 %s1443_s5, 4  ;;  %s1163_s25 = smov [#allocation7]   ;;  %s296_s26 = int_to_ptr.hbm [resolvable:$true] %s295_s26 }
  0x19   : > { %851 = dma.hbm_to_vmem [thread:$0]  (!%p1269_p10), %s296_s26, 2048, %s298_s28, [#allocation9], %s1433_s18, %s1433_s18, %s1434_s21  }
  0x1a   : > { %s278_s17 = sshll.u32 %s1444_s3, 4  ;;  %s280_s27 = sshll.u32 %s1163_s25, 4  ;;  %s279_s17 = int_to_ptr.hbm [resolvable:$true] %s278_s17  ;;  %s281_s27 = int_to_ptr.vmem [resolvable:$true] %s280_s27 }
  0x1b   : > { %848 = dma.hbm_to_vmem [thread:$0]  (!%p1269_p10), %s279_s17, 2048, %s281_s27, [#allocation6], %s1433_s18, %s1433_s18, %s1434_s21  }
  0x1c   : > { %s1164_s29 = smov [#allocation10]   ;;  %s1300_s28 = sadd.s32 1, %s1157_s12  }
  0x1d   : > { %s314_s26 = sshll.u32 %s1164_s29, 4  ;;  %s34_s14 = sadd.s32 1, %s1153_s11  ;;  %s315_s26 = int_to_ptr.vmem [resolvable:$true] %s314_s26 }
  0x1e   : > { %854 = dma.hbm_to_vmem [thread:$0]  (!%p1269_p10), %s313_s24, 2048, %s315_s26, [#allocation9], %s1433_s18, %s1433_s18, %s1434_s21  }
  0x1f   : > { %s31_s19 = ssub.s32 %s1157_s12, %s1300_s28  ;;  %p41_p11 = scmp.ne.s32.totalorder %s1153_s11, %s1149_s10 }
  0x20   : > { %p32_p12 = scmp.eq.s32.totalorder %s31_s19, 0  ;;  %p42_p13 = scmp.eq.s32.totalorder %s1157_s12, 0 }
  0x21   : > { %p1310_p0 = por %p239_p2, %p41_p11  ;;  %p867_p3 = scmp.lt.s32.totalorder %s1157_s12, 4 }
  0x22   : > { %s1316_s22 = scalar_select %p32_p12, %s1153_s11, %s34_s14  }
  0x23   : > { %p43_p5 = por %p42_p13, %p41_p11  ;;  %s331_s23 = sand.u32 1, %s1153_s11  }
  0x24   : > { %s787_s25 = sshll.u32 %s331_s23, 4  ;;  %s804_s24 = sshll.u32 %s1157_s12, 4 }
  0x25   : > { %s340_s26 = scalar_lea.hbm %s1423_s0, %s804_s24  ;;  %s335_s18 = scalar_lea.vmem [#allocation2], %s787_s25 }
  0x26   : > { %s343_s21 = sshll.u32 %s335_s18, 4  ;;  %s341_s19 = sshll.u32 %s340_s26, 4  ;;  %s344_s21 = int_to_ptr.vmem [resolvable:$true] %s343_s21  ;;  %s342_s19 = int_to_ptr.hbm [resolvable:$true] %s341_s19 }
  0x27   : > { %p1323_p2 = pnand %p867_p3, %p43_p5  ;;  %s332_s14 = scalar_lea.sflag [#allocation3], %s331_s23 }
  0x28   : > { %s1053_s3 = sshra.s32 %s342_s19, 4  ;;  %s1060_s18 = scalar_lea.hbm %s1423_s0, 64  ;;  %s1054_s3 = int_to_ptr.hbm [resolvable:$true] %s1053_s3 }
  0x29   : > { %s1055_s5 = scalar_lea.hbm %s1054_s3, 16  ;;  %p1057_p9 = pneg %p1323_p2 }
  0x2a   : > { %p1056_p7 = scmp.ne.s32.totalorder %s1054_s3, %s1055_s5  ;;  %p1061_p12 = scmp.lt.s32.totalorder %s1054_s3, %s1423_s0 }
  0x2b   : > { %p1062_p13 = scmp.lt.s32.totalorder %s1060_s18, %s1055_s5 }
  0x2c   : > { %p1058_p10 = pnand %p1057_p9, %p1056_p7 }
  0x2d   : > { %p1063_p3 = por %p1062_p13, %p1061_p12 }
  0x2e   : > { %p1059_p11 = pneg %p1058_p10 }
  0x30   : > { %p1064_p5 = pnand %p1063_p3, %p1059_p11 }
  0x32   : > { %1067 = shalt.err (!%p1064_p5)
}
  0x33   : > { %s1447_s23 = smov 8   ;;  %s1448_s26 = smov 128  }
  0x34   : > { %858 = dma.hbm_to_vmem [thread:$0]  (!%p1323_p2), %s342_s19, 256, %s344_s21, %s332_s14, %s1448_s26, %s1448_s26, %s1447_s23  }
  0x35   : > { %355 = sbr.rel (%p1261_p8) target bundleno = 636 (0x27c), region = 56  ;;  %s1343_s24 = sand.u32 (!%p1261_p8), 1, %s1149_s10  }
  0x36   : > { %s791_s3 = sshll.u32 (!%p1261_p8), %s1343_s24, 4  ;;  %s358_s5 = scalar_lea.sflag (!%p1261_p8), [#allocation3], %s1343_s24 }
  0x37   : > { %s361_s25 = scalar_lea.vmem (!%p1261_p8), [#allocation2], %s791_s3 }
  0x3a   : > { %1128 = dma.done.wait (%p1248_p4), %s358_s5, 256  }
  0x3b   : > { %1130 = vsyncadd (%p1248_p4), %s358_s5, 4294967040 }
  0x3c   : > { %1132 = dma.done.wait (%p48_p1), [#allocation6], 2064  }
  0x3d   : > { %1134 = vsyncadd (%p48_p1), [#allocation6], 4294965232 }
  0x3e   : > { %1136 = dma.done.wait (%p48_p1), [#allocation9], 4096  }
  0x3f   : > { %1138 = vsyncadd (%p48_p1), [#allocation9], 4294963200  ;;  %v419_v0 = vld [vmem:[%s361_s25] sm:$0xff]  ;;  %v420_v1 = vld [vmem:[%s361_s25 + $0x8] sm:$0xff]  ;;  %v1165_v2 = vmov 128.0   ;;  %s805_s29 = sshll.u32 %s1239_s13, 4 }
  0x40   : > { %421 = vadd.xlane.f32.xlu0 %v419_v0  ;;  %919 = vrcp.f32 %v1165_v2  ;;  %v495_v5 = vld [vmem:[#allocation7 + $0x78] sm:$0xff]  ;;  %v494_v7 = vld [vmem:[#allocation7 + $0x70] sm:$0xff]  ;;  %v493_v21 = vld [vmem:[#allocation7 + $0x68] sm:$0xff]  ;;  %s665_s5 = scalar_lea.hbm %s1432_s9, %s805_s29  ;;  %s416_s25 = scalar_lea.vmem [#allocation11], %s791_s3 }
  0x41   : > { %v538_v6 = vld [vmem:[#allocation8 + $0x78] sm:$0xff]  ;;  %500 = vmatpush.msra.mxu0 %v495_v5  ;;  %v537_v8 = vld [vmem:[#allocation8 + $0x70] sm:$0xff]  ;;  %806 = vmatpush.msra.mxu3 %v495_v5  ;;  %v536_v22 = vld [vmem:[#allocation8 + $0x68] sm:$0xff]  ;;  %s666_s1 = sshll.u32 %s416_s25, 4  ;;  %s668_s15 = sshll.u32 %s665_s5, 4  ;;  %s667_s1 = int_to_ptr.vmem [resolvable:$true] %s666_s1  ;;  %s669_s15 = int_to_ptr.hbm [resolvable:$true] %s668_s15 }
  0x42   : > { %543 = vmatpush.msra.mxu1 %v538_v6  ;;  %v492_v23 = vld [vmem:[#allocation7 + $0x60] sm:$0xff]  ;;  %v491_v25 = vld [vmem:[#allocation7 + $0x58] sm:$0xff]  ;;  %v490_v27 = vld [vmem:[#allocation7 + $0x50] sm:$0xff]  ;;  %s654_s20 = scalar_lea.sflag [#allocation4], %s1343_s24  ;;  %s1097_s21 = sshra.s32 %s669_s15, 4  ;;  %s1098_s21 = int_to_ptr.hbm [resolvable:$true] %s1097_s21 }
  0x43   : > { %501 = vmatpush.msra.mxu0 %v494_v7  ;;  %807 = vmatpush.msra.mxu3 %v494_v7  ;;  %v535_v24 = vld [vmem:[#allocation8 + $0x60] sm:$0xff]  ;;  %v534_v26 = vld [vmem:[#allocation8 + $0x58] sm:$0xff]  ;;  %v533_v28 = vld [vmem:[#allocation8 + $0x50] sm:$0xff]  ;;  %s1099_s13 = scalar_lea.hbm %s1098_s21, 16  ;;  %s1103_s3 = scalar_lea.hbm %s1432_s9, 64 }
  0x44   : > { %544 = vmatpush.msra.mxu1 %v537_v8  ;;  %v489_v29 = vld [vmem:[#allocation7 + $0x48] sm:$0xff]  ;;  %v488_v31 = vld [vmem:[#allocation7 + $0x40] sm:$0xff]  ;;  %v487_v33 = vld [vmem:[#allocation7 + $0x38] sm:$0xff]  ;;  %p1100_p1 = scmp.ne.s32.totalorder %s1098_s21, %s1099_s13  ;;  %p1104_p2 = scmp.lt.s32.totalorder %s1098_s21, %s1432_s9 }
  0x45   : > { %502 = vmatpush.msra.mxu0 %v493_v21  ;;  %808 = vmatpush.msra.mxu3 %v493_v21  ;;  %v532_v30 = vld [vmem:[#allocation8 + $0x48] sm:$0xff]  ;;  %v531_v32 = vld [vmem:[#allocation8 + $0x40] sm:$0xff]  ;;  %v530_v34 = vld [vmem:[#allocation8 + $0x38] sm:$0xff]  ;;  %p1105_p7 = scmp.lt.s32.totalorder %s1103_s3, %s1099_s13 }
  0x46   : > { %v920_v3 = vpop.eup %919  ;;  %545 = vmatpush.msra.mxu1 %v536_v22  ;;  %v486_v35 = vld [vmem:[#allocation7 + $0x30] sm:$0xff]  ;;  %v485_v37 = vld [vmem:[#allocation7 + $0x28] sm:$0xff]  ;;  %v484_v39 = vld [vmem:[#allocation7 + $0x20] sm:$0xff]  ;;  %p1101_p4 = pnand %p1100_p1, %p1310_p0 }
  0x47   : > { %v426_v4 = vmul.f32 128.0, %v920_v3  ;;  %vm430_vm0 = vweird.f32 %v920_v3  ;;  %503 = vmatpush.msra.mxu0 %v492_v23  ;;  %809 = vmatpush.msra.mxu3 %v492_v23  ;;  %v529_v36 = vld [vmem:[#allocation8 + $0x30] sm:$0xff]  ;;  %v528_v38 = vld [vmem:[#allocation8 + $0x28] sm:$0xff]  ;;  %v527_v40 = vld [vmem:[#allocation8 + $0x20] sm:$0xff]  ;;  %p1106_p9 = por %p1105_p7, %p1104_p2 }
  0x48   : > { %423 = vadd.xlane.f32.xlu0 %v420_v1  ;;  %546 = vmatpush.msra.mxu1 %v535_v24  ;;  %v483_v41 = vld [vmem:[#allocation7 + $0x18] sm:$0xff]  ;;  %v482_v43 = vld [vmem:[#allocation7 + $0x10] sm:$0xff]  ;;  %v481_v45 = vld [vmem:[#allocation7 + $0x8] sm:$0xff]  ;;  %p1102_p8 = pneg %p1101_p4 }
  0x49   : > { %v427_v9 = vsub.f32 1.0, %v426_v4  ;;  %504 = vmatpush.msra.mxu0 %v491_v25  ;;  %810 = vmatpush.msra.mxu3 %v491_v25  ;;  %v526_v42 = vld [vmem:[#allocation8 + $0x18] sm:$0xff]  ;;  %v525_v44 = vld [vmem:[#allocation8 + $0x10] sm:$0xff]  ;;  %v524_v46 = vld [vmem:[#allocation8 + $0x8] sm:$0xff] }
  0x4a   : > { %547 = vmatpush.msra.mxu1 %v534_v26  ;;  %v480_v47 = vld [vmem:[#allocation7] sm:$0xff]  ;;  %v914_v63 = vld [vmem:[#allocation5] ss:$0 sm:$0xff]  ;;  %v614_v22 = vld [vmem:[#allocation10 + $0x30] sm:$0xff]  ;;  %p1107_p10 = pnand %p1106_p9, %p1102_p8 }
  0x4b   : > { %v428_v10 = vmul.f32 %v920_v3, %v427_v9  ;;  %505 = vmatpush.msra.mxu0 %v490_v27  ;;  %811 = vmatpush.msra.mxu3 %v490_v27  ;;  %v523_v48 = vld [vmem:[#allocation8] sm:$0xff]  ;;  %v613_v23 = vld [vmem:[#allocation10 + $0x28] sm:$0xff]  ;;  %v611_v25 = vld [vmem:[#allocation10 + $0x18] sm:$0xff] }
  0x4c   : > { %548 = vmatpush.msra.mxu1 %v533_v28  ;;  %v616_v21 = vld [vmem:[#allocation10 + $0x40] sm:$0xff]  ;;  %v917_v26 = vld [vmem:[%s1429_s6] ss:$0 sm:$0xff]  ;;  %v610_v27 = vld [vmem:[#allocation10 + $0x10] sm:$0xff] }
  0x4d   : > { %v429_v11 = vadd.f32 %v920_v3, %v428_v10  ;;  %506 = vmatpush.msra.mxu0 %v489_v29  ;;  %812 = vmatpush.msra.mxu3 %v489_v29  ;;  %v612_v24 = vld [vmem:[#allocation10 + $0x20] sm:$0xff]  ;;  %v609_v28 = vld [vmem:[#allocation10 + $0x8] sm:$0xff] }
  0x4e   : > { %549 = vmatpush.msra.mxu1 %v532_v30 }
  0x4f   : > { %v1361_v12 = vsel %vm430_vm0, %v920_v3, %v429_v11  ;;  %507 = vmatpush.msra.mxu0 %v488_v31  ;;  %813 = vmatpush.msra.mxu3 %v488_v31  ;;  %v915_v3 = vld [vmem:[%s1425_s2] ss:$0 sm:$0xff]  ;;  %v608_v31 = vld [vmem:[#allocation10] sm:$0xff] }
  0x50   : > { %550 = vmatpush.msra.mxu1 %v531_v32 }
  0x51   : > { %508 = vmatpush.msra.mxu0 %v487_v33  ;;  %814 = vmatpush.msra.mxu3 %v487_v33 }
  0x52   : > { %551 = vmatpush.msra.mxu1 %v530_v34 }
  0x53   : > { %509 = vmatpush.msra.mxu0 %v486_v35  ;;  %815 = vmatpush.msra.mxu3 %v486_v35 }
  0x54   : > { %552 = vmatpush.msra.mxu1 %v529_v36 }
  0x55   : > { %510 = vmatpush.msra.mxu0 %v485_v37  ;;  %816 = vmatpush.msra.mxu3 %v485_v37 }
  0x56   : > { %553 = vmatpush.msra.mxu1 %v528_v38 }
  0x57   : > { %511 = vmatpush.msra.mxu0 %v484_v39  ;;  %817 = vmatpush.msra.mxu3 %v484_v39 }
  0x58   : > { %554 = vmatpush.msra.mxu1 %v527_v40 }
  0x59   : > { %512 = vmatpush.msra.mxu0 %v483_v41  ;;  %818 = vmatpush.msra.mxu3 %v483_v41 }
  0x5a   : > { %555 = vmatpush.msra.mxu1 %v526_v42 }
  0x5b   : > { %513 = vmatpush.msra.mxu0 %v482_v43  ;;  %819 = vmatpush.msra.mxu3 %v482_v43 }
  0x5c   : > { %556 = vmatpush.msra.mxu1 %v525_v44 }
  0x5d   : > { %514 = vmatpush.msra.mxu0 %v481_v45  ;;  %820 = vmatpush.msra.mxu3 %v481_v45 }
  0x5e   : > { %557 = vmatpush.msra.mxu1 %v524_v46  ;;  %v916_v46 = vld [vmem:[%s1427_s4] ss:$0 sm:$0xff] }
  0x5f   : > { %515 = vmatpush.msra.mxu0 %v480_v47  ;;  %821 = vmatpush.msra.mxu3 %v480_v47 }
  0x60   : > { %558 = vmatpush.msra.mxu1 %v523_v48 }
  0xb3   : > { %v422_v13 = vpop.xlane.xlu0 %421 }
  0xb4   : > { %v432_v14 = vmul.f32 %v1361_v12, %v422_v13  ;;  %v623_v13 = vld [vmem:[#allocation10 + $0x78] sm:$0xff] }
  0xb5   : > { %628 = vmatpush.msra.mxu2 %v623_v13 }
  0xb6   : > { %v1364_v15 = vsub.f32 %v419_v0, %v432_v14  ;;  %v622_v14 = vld [vmem:[#allocation10 + $0x70] sm:$0xff] }
  0xb7   : > { %629 = vmatpush.msra.mxu2 %v622_v14 }
  0xb8   : > { %v436_v16 = vmul.f32 %v1364_v15, %v1364_v15 }
  0xba   : > { %438 = vadd.xlane.f32.xlu1 %v436_v16  ;;  %v620_v16 = vld [vmem:[#allocation10 + $0x60] sm:$0xff] }
  0xbb   : > { %v424_v17 = vpop.xlane.xlu0 %423 }
  0xbc   : > { %v433_v18 = vmul.f32 %v1361_v12, %v424_v17  ;;  %v619_v17 = vld [vmem:[#allocation10 + $0x58] sm:$0xff] }
  0xbe   : > { %v1369_v19 = vsub.f32 %v420_v1, %v433_v18  ;;  %v618_v18 = vld [vmem:[#allocation10 + $0x50] sm:$0xff] }
  0xc0   : > { %v437_v20 = vmul.f32 %v1369_v19, %v1369_v19 }
  0xc2   : > { %440 = vadd.xlane.f32.xlu1 %v437_v20  ;;  %v617_v20 = vld [vmem:[#allocation10 + $0x48] sm:$0xff] }
 0x12d   : > { %v439_v49 = vpop.xlane.xlu1 %438 }
 0x12e   : > { %v442_v50 = vmul.f32 %v439_v49, %v1361_v12 }
 0x130   : > { %v444_v51 = vadd.f32 1e-05, %v442_v50 }
 0x132   : > { %921 = vrsqrt.f32 %v444_v51  ;;  %vm452_vm2 = vweird.f32 %v444_v51 }
 0x135   : > { %v441_v52 = vpop.xlane.xlu1 %440 }
 0x136   : > { %v443_v53 = vmul.f32 %v441_v52, %v1361_v12 }
 0x138   : > { %v922_v54 = vpop.eup %921  ;;  %v445_v55 = vadd.f32 1e-05, %v443_v53 }
 0x139   : > { %v447_v56 = vmul.f32 %v922_v54, %v444_v51  ;;  %vm453_vm1 = vweird.f32 %v922_v54 }
 0x13a   : > { %923 = vrsqrt.f32 %v445_v55  ;;  %vm454_vm3 = vmor %vm452_vm2, %vm453_vm1  ;;  %vm462_vm5 = vweird.f32 %v445_v55 }
 0x13b   : > { %v448_v57 = vmul.f32 %v922_v54, %v447_v56 }
 0x13d   : > { %v449_v58 = vmul.f32 0.5, %v448_v57 }
 0x13f   : > { %v450_v59 = vsub.f32 1.5, %v449_v58 }
 0x140   : > { %v924_v60 = vpop.eup %923 }
 0x141   : > { %v451_v61 = vmul.f32 %v922_v54, %v450_v59  ;;  %v457_v62 = vmul.f32 %v924_v60, %v445_v55  ;;  %vm463_vm4 = vweird.f32 %v924_v60 }
 0x142   : > { %vm464_vm6 = vmor %vm462_vm5, %vm463_vm4 }
 0x143   : > { %v458_v0 = vmul.f32 %v924_v60, %v457_v62  ;;  %v455_v1 = vsel %vm454_vm3, %v922_v54, %v451_v61 }
 0x144   : > { %v466_v2 = vmul.f32 %v455_v1, %v1364_v15  ;;  %v621_v15 = vld [vmem:[#allocation10 + $0x68] sm:$0xff] }
 0x145   : > { %v459_v4 = vmul.f32 0.5, %v458_v0  ;;  %630 = vmatpush.msra.mxu2 %v621_v15 }
 0x146   : > { %v472_v5 = vmul.f32 %v914_v63, %v466_v2 }
 0x147   : > { %v460_v6 = vsub.f32 1.5, %v459_v4  ;;  %631 = vmatpush.msra.mxu2 %v620_v16 }
 0x148   : > { %v478_v7 = vadd.f32 %v915_v3, %v472_v5  ;;  %v918_v5 = vld [vmem:[%s1431_s8] ss:$0 sm:$0xff] }
 0x149   : > { %v461_v8 = vmul.f32 %v924_v60, %v460_v6  ;;  %632 = vmatpush.msra.mxu2 %v619_v17 }
 0x14a   : > { %516 = vmatmul.f32.vlgmr.msra.gmra.mxu0 %v478_v7  ;;  %559 = vmatmul.f32.vlgmr.msra.gmra.mxu1 %v478_v7 }
 0x14b   : > { %v465_v9 = vsel %vm464_vm6, %v924_v60, %v461_v8  ;;  %633 = vmatpush.msra.mxu2 %v618_v18 }
 0x14c   : > { %v467_v10 = vmul.f32 %v465_v9, %v1369_v19  ;;  %v615_v19 = vld [vmem:[#allocation10 + $0x38] sm:$0xff] }
 0x14d   : > { %634 = vmatpush.msra.mxu2 %v617_v20 }
 0x14e   : > { %v473_v11 = vmul.f32 %v914_v63, %v467_v10 }
 0x14f   : > { %635 = vmatpush.msra.mxu2 %v616_v21 }
 0x150   : > { %v479_v12 = vadd.f32 %v915_v3, %v473_v11 }
 0x151   : > { %636 = vmatpush.msra.mxu2 %v615_v19 }
 0x152   : > { %519 = vmatmul.f32.vlgmr.msra.gmra.mxu3 %v479_v12  ;;  %562 = vmatmul.f32.gmra.mxu1 %v479_v12 }
 0x153   : > { %637 = vmatpush.msra.mxu2 %v614_v22 }
 0x155   : > { %638 = vmatpush.msra.mxu2 %v613_v23 }
 0x157   : > { %639 = vmatpush.msra.mxu2 %v612_v24 }
 0x159   : > { %640 = vmatpush.msra.mxu2 %v611_v25 }
 0x15b   : > { %641 = vmatpush.msra.mxu2 %v610_v27 }
 0x15d   : > { %642 = vmatpush.msra.mxu2 %v609_v28 }
 0x15f   : > { %643 = vmatpush.msra.mxu2 %v608_v31 }
 0x1c7   : > { %v560_v29 = vpop.f32.mrf.mxu1  ;;  %v517_v49 = vpop.f32.mrf.mxu0 }
 0x1c8   : > { %v561_v30 = vadd.f32 %v917_v26, %v560_v29  ;;  %v518_v54 = vadd.f32 %v916_v46, %v517_v49 }
 0x1ca   : > { %v797_v32 = vmul.f32 -1.442695, %v561_v30 }
 0x1cc   : > { %925 = vpow2.f32 %v797_v32 }
 0x1cf   : > { %v563_v33 = vpop.f32.mrf.mxu1 }
 0x1d0   : > { %v564_v34 = vadd.f32 %v917_v26, %v563_v33 }
 0x1d2   : > { %v926_v35 = vpop.eup %925  ;;  %v798_v36 = vmul.f32 -1.442695, %v564_v34 }
 0x1d3   : > { %v572_v37 = vadd.f32 1.0, %v926_v35 }
 0x1d4   : > { %927 = vpow2.f32 %v798_v36 }
 0x1d5   : > { %929 = vrcp.f32 %v572_v37  ;;  %v585_v43 = vand.u32 2147483648, %v572_v37  ;;  %v583_v45 = vand.u32 2147483647, %v572_v37  ;;  %vm579_vm8 = vweird.f32 %v572_v37  ;;  %v520_v63 = vpop.f32.mrf.mxu3 }
 0x1d6   : > { %v521_v3 = vadd.f32 %v916_v46, %v520_v63 }
 0x1d7   : > { %v586_v50 = vor.u32 1.1754944e-38, %v585_v43  ;;  %vm584_vm10 = vcmp.eq.f32.partialorder %v583_v45, 8.507059e+37 }
 0x1da   : > { %v928_v38 = vpop.eup %927 }
 0x1db   : > { %v930_v39 = vpop.eup %929  ;;  %v573_v40 = vadd.f32 1.0, %v928_v38 }
 0x1dc   : > { %v575_v41 = vmul.f32 %v930_v39, %v572_v37  ;;  %vm580_vm7 = vweird.f32 %v930_v39 }
 0x1dd   : > { %931 = vrcp.f32 %v573_v40  ;;  %vm581_vm9 = vmor %vm579_vm8, %vm580_vm7  ;;  %v600_v57 = vand.u32 2147483648, %v573_v40  ;;  %v598_v59 = vand.u32 2147483647, %v573_v40  ;;  %vm594_vm12 = vweird.f32 %v573_v40 }
 0x1de   : > { %v576_v42 = vsub.f32 1.0, %v575_v41 }
 0x1df   : > { %v601_v62 = vor.u32 1.1754944e-38, %v600_v57  ;;  %vm599_vm14 = vcmp.eq.f32.partialorder %v598_v59, 8.507059e+37 }
 0x1e0   : > { %v577_v44 = vmul.f32 %v930_v39, %v576_v42 }
 0x1e2   : > { %v578_v47 = vadd.f32 %v930_v39, %v577_v44 }
 0x1e3   : > { %v932_v48 = vpop.eup %931 }
 0x1e4   : > { %v582_v51 = vsel %vm581_vm9, %v930_v39, %v578_v47  ;;  %v590_v52 = vmul.f32 %v932_v48, %v573_v40  ;;  %vm595_vm11 = vweird.f32 %v932_v48 }
 0x1e5   : > { %v587_v53 = vsel %vm584_vm10, %v586_v50, %v582_v51  ;;  %vm596_vm13 = vmor %vm594_vm12, %vm595_vm11 }
 0x1e6   : > { %v604_v55 = vmul.f32 %v587_v53, %v561_v30  ;;  %v591_v56 = vsub.f32 1.0, %v590_v52 }
 0x1e8   : > { %v592_v58 = vmul.f32 %v932_v48, %v591_v56  ;;  %v606_v60 = vmul.f32 %v604_v55, %v518_v54 }
 0x1ea   : > { %v593_v61 = vadd.f32 %v932_v48, %v592_v58  ;;  %644 = vmatmul.f32.vlgmr.msra.gmra.mxu2 %v606_v60 }
 0x1ec   : > { %v597_v0 = vsel %vm596_vm13, %v932_v48, %v593_v61 }
 0x1ed   : > { %v602_v1 = vsel %vm599_vm14, %v601_v62, %v597_v0 }
 0x1ee   : > { %v605_v2 = vmul.f32 %v602_v1, %v564_v34 }
 0x1f0   : > { %v607_v4 = vmul.f32 %v605_v2, %v521_v3 }
 0x1f2   : > { %647 = vmatmul.f32.gmra.mxu2 %v607_v4 }
 0x26d   : > { %v645_v6 = vpop.f32.mrf.mxu2 }
 0x26e   : > { %v646_v7 = vadd.f32 %v918_v5, %v645_v6 }
 0x270   : > { %651 = vst [vmem:[%s416_s25] sm:$0xff] %v646_v7 }
 0x275   : > { %v648_v8 = vpop.f32.mrf.mxu2 }
 0x276   : > { %v649_v9 = vadd.f32 %v918_v5, %v648_v8 }
 0x278   : > { %652 = vst [vmem:[%s416_s25 + $0x8] sm:$0xff] %v649_v9 }
 0x279   : > { %1110 = shalt.err (!%p1107_p10)
}
 0x27a   : > { %s1166_s24 = smov 128   ;;  %s1167_s29 = smov 8  }
 0x27b   : > { %840 = dma.vmem_to_hbm [thread:$0]  (%p1310_p0), %s667_s1, 256, %s669_s15, %s654_s20, %s1166_s24, %s1166_s24, %s1167_s29  }
 0x27c PF: > { %p872_p11 = scmp.ge.s32.totalorder %s1157_s12, 2  ;;  %s683_s23 = sand.u32 1, %s1145_s30  }
 0x27d   : > { %s684_s26 = scalar_lea.sflag [#allocation4], %s683_s23 }
 0x27e   : > { %p860_p12 = pnand %p872_p11, %p1253_p6 }
 0x280   : > { %p861_p13 = pneg %p860_p12 }
 0x282   : > { %1140 = dma.done.wait (%p861_p13), %s684_s26, 256  }
 0x283   : > { %1142 = vsyncadd (%p861_p13), %s684_s26, 4294967040  ;;  %p24_p3 = scmp.ge.s32.totalorder %s1300_s28, 6   ;;  %s1449_s30 = smov %s1149_s10 }
 0x284   : > { %s1450_s10 = smov %s1153_s11  ;;  %s1451_s11 = smov %s1316_s22 }
 0x285   : > { %s1452_s12 = smov %s1300_s28  ;;  %26 = sbr.rel (!%p24_p3) target bundleno = 11 (0xb), region = 117 }
 0x28a   :  { %690 = vsyncpa [#allocation3], 1 }
 0x28b   :  { %692 = vsyncpa [#allocation3 + $0x1], 1 }
 0x28c   :  { %693 = vsyncpa [#allocation6], 1 }
 0x28d   :  { %694 = vsyncpa [#allocation9], 1 }
 0x28e   :  { %695 = vsyncpa [#allocation4], 1 }
 0x28f   :  { %697 = vsyncpa [#allocation4 + $0x1], 1 }

</bundles_post_ra>
